<compile_context>
chip_gen: v7x
topology: tpu7x:2x2x1
jax: 0.10.0
libtpu: 0.0.40
codegen_flags: <defaults>
</compile_context>

<pallas_src>
import functools

import jax
import jax.numpy as jnp
from jax import lax
from jax.experimental import pallas as pl
from jax.experimental.pallas import tpu as pltpu


def _mlp_kernel(*refs, num_hidden, clip, unroll):
    if num_hidden > 0:
        x_ref, w1_ref, b1_ref, w2_ref, b2_ref, w3_ref, b3_ref, o_ref = refs
    else:
        x_ref, w1_ref, b1_ref, w3_ref, b3_ref, o_ref = refs
        w2_ref = b2_ref = None

    def act(z):
        # clip(-10, 10) is numerically redundant before tanh in f32, but kept
        # (under the flag) to mirror the PyTorch module exactly; 2 cheap VPU
        # ops per element.
        if clip:
            z = jnp.clip(z, -10.0, 10.0)
        return jnp.tanh(z)

    # First layer: bf16 operands on the MXU, f32 accumulation, f32 epilogue.
    h = jnp.dot(x_ref[...], w1_ref[...], preferred_element_type=jnp.float32)
    h = act(h + b1_ref[...])

    if num_hidden > 0:
        def layer(hh, w_bf16, b_f32):
            z = jnp.dot(hh.astype(jnp.bfloat16), w_bf16,
                        preferred_element_type=jnp.float32)
            return act(z + b_f32)

        if unroll:
            # Typical depths: full unroll lets the LLO scheduler overlap EUP
            # tanh of layer i with MXU work of layer i+1.
            for i in range(num_hidden):
                h = layer(h, w2_ref[i], b2_ref[i])
        else:
            # Pathologically deep stacks: bound code size / live ranges with a
            # real loop (dynamic leading-axis indexing into the weight stack).
            h = lax.fori_loop(
                0, num_hidden,
                lambda i, hh: layer(hh, w2_ref[i], b2_ref[i]),
                h)

    # Output layer 256 -> 1: VPU multiply + XLU cross-lane sum instead of a
    # 1-lane-wide MXU matmul.
    o_ref[...] = (jnp.sum(h * w3_ref[...], axis=-1, keepdims=True)
                  + b3_ref[...])


def _round_up(x, m):
    return ((x + m - 1) // m) * m


def discriminator_forward(x, params, *, clip=True, tile_b=None):
    """Fused discriminator MLP on TPU via a single pallas_call.

    x:       [B, D] float32
    params:  dict with w1 [D,256], b1 [1,256], w2 [H,256,256], b2 [H,1,256],
             w3 [256,1], b3 [1,1]   (all float32; cast internally)
    returns: [B, 1] float32
    """
    w1, b1, w2, b2, w3, b3 = (params["w1"], params["b1"], params["w2"],
                              params["b2"], params["w3"], params["b3"])
    B, D = x.shape
    H = w2.shape[0]
    hidden = w1.shape[1]

    # Batch tiling: MXU-friendly, multi-step grid for large B, whole (padded)
    # batch in one tile for small B. Multiples of 128 suit v5e/v6e/v7x lanes.
    if tile_b is None:
        if B <= 256:
            tile_b = _round_up(max(B, 1), 8)
        elif B <= 2048:
            tile_b = 256
        else:
            tile_b = 512          # amortize per-step overhead on big batches
    tile_b = _round_up(tile_b, 8)
    B_pad = _round_up(B, tile_b)

    # bf16 matmul operands, f32 everything else.
    x_p = x.astype(jnp.bfloat16)
    if B_pad != B:
        x_p = jnp.pad(x_p, ((0, B_pad - B), (0, 0)))
    w1_bf = w1.astype(jnp.bfloat16)
    w2_bf = w2.astype(jnp.bfloat16)
    w3_row = w3.reshape(1, hidden).astype(jnp.float32)
    b1_f = b1.reshape(1, hidden).astype(jnp.float32)
    b2_f = b2.reshape(H, 1, hidden).astype(jnp.float32)
    b3_f = b3.reshape(1, 1).astype(jnp.float32)

    unroll = H <= 8
    kernel = functools.partial(_mlp_kernel, num_hidden=H, clip=clip,
                               unroll=unroll)

    grid = (B_pad // tile_b,)

    # Constant (grid-invariant) blocks for the weights/biases: fetched once,
    # kept resident in VMEM across grid steps.
    def const(shape):
        return pl.BlockSpec(shape, lambda i, _s=len(shape): (0,) * _s)

    in_specs = [pl.BlockSpec((tile_b, D), lambda i: (i, 0)),   # x tile
                const((D, hidden)),                             # w1 (bf16)
                const((1, hidden))]                             # b1
    args = [x_p, w1_bf, b1_f]
    if H > 0:                                                   # skip when H==0
        in_specs += [const((H, hidden, hidden)),                # w2 stack (bf16)
                     const((H, 1, hidden))]                     # b2 stack
        args += [w2_bf, b2_f]
    in_specs += [const((1, hidden)),                            # w3 as a row
                 const((1, 1))]                                 # b3
    args += [w3_row, b3_f]

    # Explicit VMEM budget: double-buffered bf16 weights + x tile + biases +
    # output + a few f32 activation temporaries, clamped to [16 MiB, 64 MiB].
    wbytes = 2 * 2 * (D * hidden + H * hidden * hidden)
    bbytes = 2 * 4 * (hidden + H * hidden + hidden + 1)
    xbytes = 2 * 2 * tile_b * D
    obytes = 2 * 4 * tile_b
    actbytes = 8 * 4 * tile_b * hidden
    vmem_limit = wbytes + bbytes + xbytes + obytes + actbytes + (4 << 20)
    vmem_limit = int(min(max(vmem_limit, 16 << 20), 64 << 20))

    out = pl.pallas_call(
        kernel,
        out_shape=jax.ShapeDtypeStruct((B_pad, 1), jnp.float32),
        grid_spec=pltpu.PrefetchScalarGridSpec(
            num_scalar_prefetch=0,
            grid=grid,
            in_specs=in_specs,
            out_specs=pl.BlockSpec((tile_b, 1), lambda i: (i, 0)),
        ),
        compiler_params=pltpu.CompilerParams(
            dimension_semantics=("parallel",),
            vmem_limit_bytes=vmem_limit),
    )(*args)
    return out[:B]


def init_params(key, input_dim, hidden_dims, hidden=256):
    """Deterministic Kaiming-normal-style init (std = sqrt(2 / fan_in))."""
    ks = jax.random.split(key, 3 + hidden_dims)
    w1 = jax.random.normal(ks[0], (input_dim, hidden), jnp.float32) * jnp.sqrt(
        2.0 / input_dim)
    b1 = jnp.zeros((1, hidden), jnp.float32)
    if hidden_dims > 0:
        w2 = jnp.stack([
            jax.random.normal(ks[1 + i], (hidden, hidden), jnp.float32)
            * jnp.sqrt(2.0 / hidden) for i in range(hidden_dims)
        ])
    else:
        w2 = jnp.zeros((0, hidden, hidden), jnp.float32)
    b2 = jnp.zeros((max(hidden_dims, 0), 1, hidden), jnp.float32)
    w3 = jax.random.normal(ks[-1], (hidden, 1), jnp.float32) * jnp.sqrt(
        2.0 / hidden)
    b3 = jnp.zeros((1, 1), jnp.float32)
    return dict(w1=w1, b1=b1, w2=w2, b2=b2, w3=w3, b3=b3)


def _reference(x, p, clip=True):
    h = x @ p["w1"] + p["b1"]
    h = jnp.tanh(jnp.clip(h, -10, 10) if clip else h)
    for i in range(p["w2"].shape[0]):
        h = h @ p["w2"][i] + p["b2"][i]
        h = jnp.tanh(jnp.clip(h, -10, 10) if clip else h)
    return h @ p["w3"] + p["b3"]


if __name__ == "__main__":
    key = jax.random.PRNGKey(0)
    kx, kp, kx2 = jax.random.split(key, 3)

    # jit the wrapper so the pad/cast/slice plumbing fuses around the kernel.
    fwd = jax.jit(discriminator_forward)

    # Small batch (single grid step, whole batch in one tile).
    batch, input_dim, hidden_dims = 8, 32, 2
    x = jax.random.normal(kx, (batch, input_dim), jnp.float32)
    params = init_params(kp, input_dim, hidden_dims)
    out = jax.block_until_ready(fwd(x, params))
    ref = _reference(x, params, clip=True)
    assert out.shape == (batch, 1)
    assert jnp.allclose(out, ref, atol=5e-2, rtol=5e-2), (out, ref)

    # Larger batch: exercises zero-padding + multi-step "parallel" grid.
    batch2 = 300
    x2 = jax.random.normal(kx2, (batch2, input_dim), jnp.float32)
    out2 = jax.block_until_ready(fwd(x2, params))
    ref2 = _reference(x2, params, clip=True)
    assert out2.shape == (batch2, 1)
    assert jnp.allclose(out2, ref2, atol=5e-2, rtol=5e-2)

    # hidden_dims == 0 path (w2/b2 inputs skipped entirely).
    params0 = init_params(kp, input_dim, 0)
    out0 = jax.block_until_ready(fwd(x, params0))
    ref0 = _reference(x, params0, clip=True)
    assert jnp.allclose(out0, ref0, atol=5e-2, rtol=5e-2)

    print("KERNEL_OK")
</pallas_src>

<mosaic_0001>
module attributes {stable_mosaic.version = 11 : i64} {
  func.func @_mlp_kernel(%arg0: i32, %arg1: memref<8x32xbf16, #tpu.memory_space<vmem>>, %arg2: memref<32x256xbf16, #tpu.memory_space<vmem>>, %arg3: memref<1x256xf32, #tpu.memory_space<vmem>>, %arg4: memref<2x256x256xbf16, #tpu.memory_space<vmem>>, %arg5: memref<2x1x256xf32, #tpu.memory_space<vmem>>, %arg6: memref<1x256xf32, #tpu.memory_space<vmem>>, %arg7: memref<1x1xf32, #tpu.memory_space<vmem>>, %arg8: memref<8x1xf32, #tpu.memory_space<vmem>>) attributes {dimension_semantics = [#tpu.dimension_semantics<parallel>], iteration_bounds = array<i64: 1>, scalar_prefetch = 0 : i64, scratch_operands = 0 : i64, tpu.core_type = #tpu.core_type<tc>, window_params = [{transform_indices = @transform_0, window_bounds = array<i64: 8, 32>}, {pipeline_mode = #tpu.pipeline_mode<synchronous>, transform_indices = @transform_1, window_bounds = array<i64: 32, 256>}, {pipeline_mode = #tpu.pipeline_mode<synchronous>, transform_indices = @transform_2, window_bounds = array<i64: 1, 256>}, {pipeline_mode = #tpu.pipeline_mode<synchronous>, transform_indices = @transform_3, window_bounds = array<i64: 2, 256, 256>}, {pipeline_mode = #tpu.pipeline_mode<synchronous>, transform_indices = @transform_4, window_bounds = array<i64: 2, 1, 256>}, {pipeline_mode = #tpu.pipeline_mode<synchronous>, transform_indices = @transform_5, window_bounds = array<i64: 1, 256>}, {pipeline_mode = #tpu.pipeline_mode<synchronous>, transform_indices = @transform_6, window_bounds = array<i64: 1, 1>}, {transform_indices = @transform_7, window_bounds = array<i64: 8, 1>}]} {
    %c0 = arith.constant 0 : index
    %c0_0 = arith.constant 0 : index
    %0 = vector.load %arg1[%c0, %c0_0] : memref<8x32xbf16, #tpu.memory_space<vmem>>, vector<8x32xbf16>
    %c0_1 = arith.constant 0 : index
    %c0_2 = arith.constant 0 : index
    %1 = vector.load %arg2[%c0_1, %c0_2] : memref<32x256xbf16, #tpu.memory_space<vmem>>, vector<32x256xbf16>
    %cst = arith.constant dense<0.000000e+00> : vector<8x256xf32>
    %2 = tpu.matmul %0, %1, %cst {dimension_numbers = #tpu.dot_dimension_numbers<[1], [0], [0], [1], [0, 0, 1, 1], [], []>} : vector<8x32xbf16>, vector<32x256xbf16>, vector<8x256xf32> -> vector<8x256xf32>
    %c0_3 = arith.constant 0 : index
    %c0_4 = arith.constant 0 : index
    %3 = vector.load %arg3[%c0_3, %c0_4] : memref<1x256xf32, #tpu.memory_space<vmem>>, vector<1x256xf32>
    %4 = vector.broadcast %3 : vector<1x256xf32> to vector<8x256xf32>
    %5 = arith.addf %2, %4 : vector<8x256xf32>
    %cst_5 = arith.constant -1.000000e+01 : f32
    %cst_6 = arith.constant 1.000000e+01 : f32
    %6 = vector.broadcast %cst_5 : f32 to vector<8x256xf32>
    %7 = arith.maximumf %6, %5 : vector<8x256xf32>
    %8 = vector.broadcast %cst_6 : f32 to vector<8x256xf32>
    %9 = arith.minimumf %8, %7 : vector<8x256xf32>
    %10 = math.tanh %9 : vector<8x256xf32>
    %c0_7 = arith.constant 0 : index
    %c0_8 = arith.constant 0 : index
    %c0_9 = arith.constant 0 : index
    %11 = vector.load %arg4[%c0_7, %c0_8, %c0_9] : memref<2x256x256xbf16, #tpu.memory_space<vmem>>, vector<1x256x256xbf16>
    %12 = vector.shape_cast %11 : vector<1x256x256xbf16> to vector<256x256xbf16>
    %c0_10 = arith.constant 0 : index
    %c0_11 = arith.constant 0 : index
    %c0_12 = arith.constant 0 : index
    %13 = vector.load %arg5[%c0_10, %c0_11, %c0_12] : memref<2x1x256xf32, #tpu.memory_space<vmem>>, vector<1x1x256xf32>
    %14 = vector.shape_cast %13 : vector<1x1x256xf32> to vector<1x256xf32>
    %15 = arith.truncf %10 : vector<8x256xf32> to vector<8x256xbf16>
    %cst_13 = arith.constant dense<0.000000e+00> : vector<8x256xf32>
    %16 = tpu.matmul %15, %12, %cst_13 {dimension_numbers = #tpu.dot_dimension_numbers<[1], [0], [0], [1], [0, 0, 1, 1], [], []>} : vector<8x256xbf16>, vector<256x256xbf16>, vector<8x256xf32> -> vector<8x256xf32>
    %17 = vector.broadcast %14 : vector<1x256xf32> to vector<8x256xf32>
    %18 = arith.addf %16, %17 : vector<8x256xf32>
    %cst_14 = arith.constant -1.000000e+01 : f32
    %cst_15 = arith.constant 1.000000e+01 : f32
    %19 = vector.broadcast %cst_14 : f32 to vector<8x256xf32>
    %20 = arith.maximumf %19, %18 : vector<8x256xf32>
    %21 = vector.broadcast %cst_15 : f32 to vector<8x256xf32>
    %22 = arith.minimumf %21, %20 : vector<8x256xf32>
    %23 = math.tanh %22 : vector<8x256xf32>
    %c1 = arith.constant 1 : index
    %c0_16 = arith.constant 0 : index
    %c0_17 = arith.constant 0 : index
    %24 = vector.load %arg4[%c1, %c0_16, %c0_17] : memref<2x256x256xbf16, #tpu.memory_space<vmem>>, vector<1x256x256xbf16>
    %25 = vector.shape_cast %24 : vector<1x256x256xbf16> to vector<256x256xbf16>
    %c1_18 = arith.constant 1 : index
    %c0_19 = arith.constant 0 : index
    %c0_20 = arith.constant 0 : index
    %26 = vector.load %arg5[%c1_18, %c0_19, %c0_20] : memref<2x1x256xf32, #tpu.memory_space<vmem>>, vector<1x1x256xf32>
    %27 = vector.shape_cast %26 : vector<1x1x256xf32> to vector<1x256xf32>
    %28 = arith.truncf %23 : vector<8x256xf32> to vector<8x256xbf16>
    %cst_21 = arith.constant dense<0.000000e+00> : vector<8x256xf32>
    %29 = tpu.matmul %28, %25, %cst_21 {dimension_numbers = #tpu.dot_dimension_numbers<[1], [0], [0], [1], [0, 0, 1, 1], [], []>} : vector<8x256xbf16>, vector<256x256xbf16>, vector<8x256xf32> -> vector<8x256xf32>
    %30 = vector.broadcast %27 : vector<1x256xf32> to vector<8x256xf32>
    %31 = arith.addf %29, %30 : vector<8x256xf32>
    %cst_22 = arith.constant -1.000000e+01 : f32
    %cst_23 = arith.constant 1.000000e+01 : f32
    %32 = vector.broadcast %cst_22 : f32 to vector<8x256xf32>
    %33 = arith.maximumf %32, %31 : vector<8x256xf32>
    %34 = vector.broadcast %cst_23 : f32 to vector<8x256xf32>
    %35 = arith.minimumf %34, %33 : vector<8x256xf32>
    %36 = math.tanh %35 : vector<8x256xf32>
    %c0_24 = arith.constant 0 : index
    %c0_25 = arith.constant 0 : index
    %37 = vector.load %arg6[%c0_24, %c0_25] : memref<1x256xf32, #tpu.memory_space<vmem>>, vector<1x256xf32>
    %38 = vector.broadcast %37 : vector<1x256xf32> to vector<8x256xf32>
    %39 = arith.mulf %36, %38 : vector<8x256xf32>
    %cst_26 = arith.constant dense<0.000000e+00> : vector<8xf32>
    %40 = vector.multi_reduction <add>, %39, %cst_26 [1] : vector<8x256xf32> to vector<8xf32>
    %41 = vector.shape_cast %40 : vector<8xf32> to vector<8x1xf32>
    %c0_27 = arith.constant 0 : index
    %c0_28 = arith.constant 0 : index
    %42 = vector.load %arg7[%c0_27, %c0_28] : memref<1x1xf32, #tpu.memory_space<vmem>>, vector<1x1xf32>
    %43 = vector.broadcast %42 : vector<1x1xf32> to vector<8x1xf32>
    %44 = arith.addf %41, %43 : vector<8x1xf32>
    %c0_29 = arith.constant 0 : index
    %c0_30 = arith.constant 0 : index
    %45 = vector.load %arg8[%c0_29, %c0_30] : memref<8x1xf32, #tpu.memory_space<vmem>>, vector<8x1xf32>
    tpu.vector_store %arg8[%c0_29, %c0_30], %44 {strides = array<i32>} : memref<8x1xf32, #tpu.memory_space<vmem>>, vector<8x1xf32>,
    return
  }
  func.func @transform_0(%arg0: i32) -> (i32, i32) {
    %c0_i32 = arith.constant 0 : i32
    %c0_i32_0 = arith.constant 0 : i32
    return %arg0, %c0_i32 : i32, i32
  }
  func.func @transform_1(%arg0: i32) -> (i32, i32) {
    %c0_i32 = arith.constant 0 : i32
    %c0_i32_0 = arith.constant 0 : i32
    %c0_i32_1 = arith.constant 0 : i32
    return %c0_i32, %c0_i32_0 : i32, i32
  }
  func.func @transform_2(%arg0: i32) -> (i32, i32) {
    %c0_i32 = arith.constant 0 : i32
    %c0_i32_0 = arith.constant 0 : i32
    %c0_i32_1 = arith.constant 0 : i32
    return %c0_i32, %c0_i32_0 : i32, i32
  }
  func.func @transform_3(%arg0: i32) -> (i32, i32, i32) {
    %c0_i32 = arith.constant 0 : i32
    %c0_i32_0 = arith.constant 0 : i32
    %c0_i32_1 = arith.constant 0 : i32
    %c0_i32_2 = arith.constant 0 : i32
    return %c0_i32, %c0_i32_0, %c0_i32_1 : i32, i32, i32
  }
  func.func @transform_4(%arg0: i32) -> (i32, i32, i32) {
    %c0_i32 = arith.constant 0 : i32
    %c0_i32_0 = arith.constant 0 : i32
    %c0_i32_1 = arith.constant 0 : i32
    %c0_i32_2 = arith.constant 0 : i32
    return %c0_i32, %c0_i32_0, %c0_i32_1 : i32, i32, i32
  }
  func.func @transform_5(%arg0: i32) -> (i32, i32) {
    %c0_i32 = arith.constant 0 : i32
    %c0_i32_0 = arith.constant 0 : i32
    %c0_i32_1 = arith.constant 0 : i32
    return %c0_i32, %c0_i32_0 : i32, i32
  }
  func.func @transform_6(%arg0: i32) -> (i32, i32) {
    %c0_i32 = arith.constant 0 : i32
    %c0_i32_0 = arith.constant 0 : i32
    %c0_i32_1 = arith.constant 0 : i32
    return %c0_i32, %c0_i32_0 : i32, i32
  }
  func.func @transform_7(%arg0: i32) -> (i32, i32) {
    %c0_i32 = arith.constant 0 : i32
    %c0_i32_0 = arith.constant 0 : i32
    return %arg0, %c0_i32 : i32, i32
  }
}

</mosaic_0001>

<bundles_post_ra>
// kernel: discriminator_forward.1
= control target key start
LH: loop header
LB: loop body
LE: loop exit
PB: predicated region body
PF: predicated region fallthrough
CT: control target
= control target key end

     0   :  { %v880_v1 = vmov 0   ;;  %vm66_vm0 = vcmask 261120   ;;  %v36_v60 = vlaneseq  ;;  %vm650_vm1 = vcmask 7168   ;;  %s1158_s1 = inlined_call_operand.vmem [shape: bf16[32,256], index: 1, kind: input, shape index: {}]   ;;  %s1159_s3 = inlined_call_operand.vmem [shape: bf16[2,256,256], index: 3, kind: input, shape index: {}]   ;;  %s1160_s0 = inlined_call_operand.vmem [shape: bf16[8,32], index: 0, kind: input, shape index: {}]   ;;  %s1161_s2 = inlined_call_operand.vmem [shape: f32[1,256], index: 2, kind: input, shape index: {}]   ;;  %s1162_s4 = inlined_call_operand.vmem [shape: f32[2,1,256], index: 4, kind: input, shape index: {}]   ;;  %s1163_s6 = inlined_call_operand.<no memory space> [shape: f32[1,1], index: 6, kind: input, shape index: {}]   ;;  %s1164_s5 = inlined_call_operand.vmem [shape: f32[1,256], index: 5, kind: input, shape index: {}]   ;;  %s1165_s7 = inlined_call_operand.vmem [shape: f32[8,1], index: 7, kind: output, shape index: {}]  }
   0x1   :  { %v766_v0 = vld [vmem:[%s1158_s1 + $0x4] ss:$8 sps:$4 sm:$0xff]   ;;  %102 = vmatprep.mubr.bf16.mxu0 %v880_v1  ;;  %v768_v2 = vld [vmem:[%s1158_s1] ss:$8 sps:$4 sm:$0xff]   ;;  %v769_v3 = vld [vmem:[%s1158_s1 + $0x14] ss:$8 sps:$4 sm:$0xff]  }
   0x2   :  { %70 = vmatprep.subr.bf16.mxu0 %v766_v0  ;;  %v771_v4 = vld [vmem:[%s1158_s1 + $0x10] ss:$8 sps:$4 sm:$0xff]   ;;  %v772_v5 = vld [vmem:[%s1159_s3 + $0x4] ss:$8 sps:$4 sm:$0xff]   ;;  %v774_v6 = vld [vmem:[%s1159_s3] ss:$8 sps:$4 sm:$0xff]  }
   0x3   :  { %71 = vmatpush1.bf16.msra.mxu0 %v768_v2  ;;  %323 = vmatprep.subr.bf16.mxu1 %v772_v5  ;;  %v775_v7 = vld [vmem:[%s1159_s3 + $0x14] ss:$8 sps:$4 sm:$0xff]   ;;  %v29_v8 = vld [vmem:[%s1160_s0] sm:$0xf]  ;;  %v777_v9 = vld [vmem:[%s1159_s3 + $0x10] ss:$8 sps:$4 sm:$0xff]  }
   0x4   :  { %72 = vmatprep.subr.bf16.mxu0 %v769_v3  ;;  %324 = vmatpush1.bf16.msra.mxu1 %v774_v6  ;;  %v778_v10 = vld [vmem:[%s1159_s3 + $0x24] ss:$8 sps:$4 sm:$0xff]   ;;  %v780_v11 = vld [vmem:[%s1159_s3 + $0x20] ss:$8 sps:$4 sm:$0xff]   ;;  %v781_v12 = vld [vmem:[%s1159_s3 + $0x34] ss:$8 sps:$4 sm:$0xff]  }
   0x5   :  { %325 = vmatprep.subr.bf16.mxu1 %v775_v7  ;;  %v783_v13 = vld [vmem:[%s1159_s3 + $0x30] ss:$8 sps:$4 sm:$0xff]   ;;  %v784_v14 = vld [vmem:[%s1159_s3 + $0x44] ss:$8 sps:$4 sm:$0xff]   ;;  %v786_v15 = vld [vmem:[%s1159_s3 + $0x40] ss:$8 sps:$4 sm:$0xff]  }
   0x6   :  { %v787_v16 = vld [vmem:[%s1159_s3 + $0x54] ss:$8 sps:$4 sm:$0xff]   ;;  %v789_v17 = vld [vmem:[%s1159_s3 + $0x50] ss:$8 sps:$4 sm:$0xff]   ;;  %v790_v18 = vld [vmem:[%s1159_s3 + $0x64] ss:$8 sps:$4 sm:$0xff]  }
   0x7   :  { %73 = vmatpush1.bf16.msra.mxu0 %v771_v4  ;;  %v792_v19 = vld [vmem:[%s1159_s3 + $0x60] ss:$8 sps:$4 sm:$0xff]   ;;  %v793_v20 = vld [vmem:[%s1159_s3 + $0x74] ss:$8 sps:$4 sm:$0xff]   ;;  %v795_v21 = vld [vmem:[%s1159_s3 + $0x70] ss:$8 sps:$4 sm:$0xff]  }
   0x8   :  { %326 = vmatpush1.bf16.msra.mxu1 %v777_v9  ;;  %v796_v22 = vld [vmem:[%s1159_s3 + $0x84] ss:$8 sps:$4 sm:$0xff]   ;;  %v798_v23 = vld [vmem:[%s1159_s3 + $0x80] ss:$8 sps:$4 sm:$0xff]   ;;  %v799_v24 = vld [vmem:[%s1159_s3 + $0x94] ss:$8 sps:$4 sm:$0xff]  }
   0x9   :  { %327 = vmatprep.subr.bf16.mxu1 %v778_v10  ;;  %v801_v25 = vld [vmem:[%s1159_s3 + $0x90] ss:$8 sps:$4 sm:$0xff]   ;;  %v802_v26 = vld [vmem:[%s1159_s3 + $0xa4] ss:$8 sps:$4 sm:$0xff]   ;;  %v804_v27 = vld [vmem:[%s1159_s3 + $0xa0] ss:$8 sps:$4 sm:$0xff]  }
   0xa   :  { %660 = vmatmul.mubr.msk.bf16.vlgmr.msra.gmra.mrb[0].mxu0 %vm66_vm0, %v29_v8  ;;  %v805_v28 = vld [vmem:[%s1159_s3 + $0xb4] ss:$8 sps:$4 sm:$0xff]   ;;  %v807_v29 = vld [vmem:[%s1159_s3 + $0xb0] ss:$8 sps:$4 sm:$0xff]   ;;  %v808_v30 = vld [vmem:[%s1159_s3 + $0xc4] ss:$8 sps:$4 sm:$0xff]  }
   0xb   :  { %v810_v31 = vld [vmem:[%s1159_s3 + $0xc0] ss:$8 sps:$4 sm:$0xff]   ;;  %v811_v32 = vld [vmem:[%s1159_s3 + $0xd4] ss:$8 sps:$4 sm:$0xff]   ;;  %v813_v33 = vld [vmem:[%s1159_s3 + $0xd0] ss:$8 sps:$4 sm:$0xff]  }
   0xc   :  { %328 = vmatpush1.bf16.msra.mxu1 %v780_v11  ;;  %v814_v34 = vld [vmem:[%s1159_s3 + $0xe4] ss:$8 sps:$4 sm:$0xff]   ;;  %v816_v35 = vld [vmem:[%s1159_s3 + $0xe0] ss:$8 sps:$4 sm:$0xff]   ;;  %v817_v36 = vld [vmem:[%s1159_s3 + $0xf4] ss:$8 sps:$4 sm:$0xff]  }
   0xd   :  { %329 = vmatprep.subr.bf16.mxu1 %v781_v12  ;;  %v819_v37 = vld [vmem:[%s1159_s3 + $0xf0] ss:$8 sps:$4 sm:$0xff]   ;;  %v820_v38 = vld [vmem:[%s1159_s3 + $0x100] ss:$8 sps:$4 sm:$0xff]   ;;  %v822_v39 = vld [vmem:[%s1159_s3 + $0x104] ss:$8 sps:$4 sm:$0xff]  }
   0xe   :  { %v825_v40 = vld [vmem:[%s1159_s3 + $0x114] ss:$8 sps:$4 sm:$0xff]   ;;  %578 = vmatprep.subr.bf16.mxu0 %v822_v39  ;;  %v823_v41 = vld [vmem:[%s1159_s3 + $0x110] ss:$8 sps:$4 sm:$0xff]   ;;  %v828_v42 = vld [vmem:[%s1159_s3 + $0x124] ss:$8 sps:$4 sm:$0xff]  }
   0xf   :  { %579 = vmatpush1.bf16.msra.mxu0 %v820_v38  ;;  %v826_v43 = vld [vmem:[%s1159_s3 + $0x120] ss:$8 sps:$4 sm:$0xff]   ;;  %v831_v44 = vld [vmem:[%s1159_s3 + $0x134] ss:$8 sps:$4 sm:$0xff]   ;;  %v829_v45 = vld [vmem:[%s1159_s3 + $0x130] ss:$8 sps:$4 sm:$0xff]  }
  0x10   :  { %330 = vmatpush1.bf16.msra.mxu1 %v783_v13  ;;  %580 = vmatprep.subr.bf16.mxu0 %v825_v40  ;;  %v834_v46 = vld [vmem:[%s1159_s3 + $0x144] ss:$8 sps:$4 sm:$0xff]   ;;  %v832_v47 = vld [vmem:[%s1159_s3 + $0x140] ss:$8 sps:$4 sm:$0xff]   ;;  %v837_v48 = vld [vmem:[%s1159_s3 + $0x154] ss:$8 sps:$4 sm:$0xff]   ;;  %v12_v40 = vstv %s1163_s6 }
  0x11   :  { %331 = vmatprep.subr.bf16.mxu1 %v784_v14  ;;  %v835_v49 = vld [vmem:[%s1159_s3 + $0x150] ss:$8 sps:$4 sm:$0xff]   ;;  %v840_v50 = vld [vmem:[%s1159_s3 + $0x164] ss:$8 sps:$4 sm:$0xff]   ;;  %v838_v51 = vld [vmem:[%s1159_s3 + $0x160] ss:$8 sps:$4 sm:$0xff]  }
  0x12   :  { %v843_v52 = vld [vmem:[%s1159_s3 + $0x174] ss:$8 sps:$4 sm:$0xff]   ;;  %v841_v53 = vld [vmem:[%s1159_s3 + $0x170] ss:$8 sps:$4 sm:$0xff]   ;;  %v846_v54 = vld [vmem:[%s1159_s3 + $0x184] ss:$8 sps:$4 sm:$0xff]  }
  0x13   :  { %581 = vmatpush1.bf16.msra.mxu0 %v823_v41  ;;  %v844_v55 = vld [vmem:[%s1159_s3 + $0x180] ss:$8 sps:$4 sm:$0xff]   ;;  %v849_v56 = vld [vmem:[%s1159_s3 + $0x194] ss:$8 sps:$4 sm:$0xff]   ;;  %v847_v57 = vld [vmem:[%s1159_s3 + $0x190] ss:$8 sps:$4 sm:$0xff]  }
  0x14   :  { %332 = vmatpush1.bf16.msra.mxu1 %v786_v15  ;;  %582 = vmatprep.subr.bf16.mxu0 %v828_v42  ;;  %v852_v58 = vld [vmem:[%s1159_s3 + $0x1a4] ss:$8 sps:$4 sm:$0xff]   ;;  %v850_v59 = vld [vmem:[%s1159_s3 + $0x1a0] ss:$8 sps:$4 sm:$0xff]   ;;  %v37_v61 = vshrl.u32 %v36_v60, 7 }
  0x15   :  { %333 = vmatprep.subr.bf16.mxu1 %v787_v16  ;;  %v34_v63 = vld [vmem:[%s1161_s2] sm:$0x3]  ;;  %v855_v15 = vld [vmem:[%s1159_s3 + $0x1b4] ss:$8 sps:$4 sm:$0xff]   ;;  %v853_v16 = vld [vmem:[%s1159_s3 + $0x1b0] ss:$8 sps:$4 sm:$0xff]  }
  0x16   :  { %v1098_v62 = vsub.s32 0, %v37_v61  ;;  %v1103_v0 = vsub.s32 1, %v37_v61  ;;  %13 = vst [vmem:[#allocation2] sm:$0x1] %v12_v40  ;;  %v729_v41 = vld [vmem:[%s1162_s4 + $0x2] sm:$0x3] }
  0x17   :  { %583 = vmatpush1.bf16.msra.mxu0 %v826_v43 }
  0x18   :  { %334 = vmatpush1.bf16.msra.mxu1 %v789_v17  ;;  %584 = vmatprep.subr.bf16.mxu0 %v831_v44  ;;  %v39_v1 = vrot.slane %v34_v63, %v1098_v62  ;;  %v43_v2 = vrot.slane %v34_v63, %v1103_v0  ;;  %v858_v17 = vld [vmem:[%s1159_s3 + $0x1c4] ss:$8 sps:$4 sm:$0xff]   ;;  %v411_v42 = vrot.slane %v729_v41, %v1098_v62 }
  0x19   :  { %335 = vmatprep.subr.bf16.mxu1 %v790_v18  ;;  %v856_v18 = vld [vmem:[%s1159_s3 + $0x1c0] ss:$8 sps:$4 sm:$0xff]   ;;  %v415_v43 = vrot.slane %v729_v41, %v1103_v0 }
  0x1b   :  { %585 = vmatpush1.bf16.msra.mxu0 %v829_v45 }
  0x1c   :  { %336 = vmatpush1.bf16.msra.mxu1 %v792_v19  ;;  %586 = vmatprep.subr.bf16.mxu0 %v834_v46  ;;  %v861_v19 = vld [vmem:[%s1159_s3 + $0x1d4] ss:$8 sps:$4 sm:$0xff]  }
  0x1d   :  { %337 = vmatprep.subr.bf16.mxu1 %v793_v20  ;;  %v859_v20 = vld [vmem:[%s1159_s3 + $0x1d0] ss:$8 sps:$4 sm:$0xff]   ;;  %v764_v60 = vld [vmem:[#allocation2] ss:$0 sm:$0xff] }
  0x1f   :  { %587 = vmatpush1.bf16.msra.mxu0 %v832_v47 }
  0x20   :  { %338 = vmatpush1.bf16.msra.mxu1 %v795_v21  ;;  %588 = vmatprep.subr.bf16.mxu0 %v837_v48  ;;  %v864_v21 = vld [vmem:[%s1159_s3 + $0x1e4] ss:$8 sps:$4 sm:$0xff]  }
  0x21   :  { %339 = vmatprep.subr.bf16.mxu1 %v796_v22  ;;  %v862_v22 = vld [vmem:[%s1159_s3 + $0x1e0] ss:$8 sps:$4 sm:$0xff]  }
  0x23   :  { %589 = vmatpush1.bf16.msra.mxu0 %v835_v49 }
  0x24   :  { %340 = vmatpush1.bf16.msra.mxu1 %v798_v23  ;;  %590 = vmatprep.subr.bf16.mxu0 %v840_v50  ;;  %v867_v23 = vld [vmem:[%s1159_s3 + $0x1f4] ss:$8 sps:$4 sm:$0xff]  }
  0x25   :  { %341 = vmatprep.subr.bf16.mxu1 %v799_v24  ;;  %v865_v24 = vld [vmem:[%s1159_s3 + $0x1f0] ss:$8 sps:$4 sm:$0xff]  }
  0x27   :  { %591 = vmatpush1.bf16.msra.mxu0 %v838_v51 }
  0x28   :  { %342 = vmatpush1.bf16.msra.mxu1 %v801_v25  ;;  %592 = vmatprep.subr.bf16.mxu0 %v843_v52  ;;  %v149_v25 = vld [vmem:[%s1162_s4] sm:$0x3] }
  0x29   :  { %343 = vmatprep.subr.bf16.mxu1 %v802_v26  ;;  %v156_v26 = vrot.slane %v149_v25, %v1098_v62  ;;  %v625_v52 = vld [vmem:[%s1164_s5] sm:$0x3] }
  0x2b   :  { %593 = vmatpush1.bf16.msra.mxu0 %v841_v53  ;;  %v630_v53 = vrot.slane %v625_v52, %v1098_v62 }
  0x2c   :  { %344 = vmatpush1.bf16.msra.mxu1 %v804_v27  ;;  %594 = vmatprep.subr.bf16.mxu0 %v846_v54  ;;  %v160_v27 = vrot.slane %v149_v25, %v1103_v0  ;;  %v634_v54 = vrot.slane %v625_v52, %v1103_v0 }
  0x2d   :  { %345 = vmatprep.subr.bf16.mxu1 %v805_v28 }
  0x2f   :  { %595 = vmatpush1.bf16.msra.mxu0 %v844_v55 }
  0x30   :  { %346 = vmatpush1.bf16.msra.mxu1 %v807_v29  ;;  %596 = vmatprep.subr.bf16.mxu0 %v849_v56 }
  0x31   :  { %347 = vmatprep.subr.bf16.mxu1 %v808_v30 }
  0x33   :  { %597 = vmatpush1.bf16.msra.mxu0 %v847_v57 }
  0x34   :  { %348 = vmatpush1.bf16.msra.mxu1 %v810_v31  ;;  %598 = vmatprep.subr.bf16.mxu0 %v852_v58 }
  0x35   :  { %349 = vmatprep.subr.bf16.mxu1 %v811_v32 }
  0x37   :  { %599 = vmatpush1.bf16.msra.mxu0 %v850_v59 }
  0x38   :  { %350 = vmatpush1.bf16.msra.mxu1 %v813_v33  ;;  %600 = vmatprep.subr.bf16.mxu0 %v855_v15 }
  0x39   :  { %351 = vmatprep.subr.bf16.mxu1 %v814_v34 }
  0x3b   :  { %601 = vmatpush1.bf16.msra.mxu0 %v853_v16 }
  0x3c   :  { %352 = vmatpush1.bf16.msra.mxu1 %v816_v35  ;;  %602 = vmatprep.subr.bf16.mxu0 %v858_v17 }
  0x3d   :  { %353 = vmatprep.subr.bf16.mxu1 %v817_v36 }
  0x3f   :  { %603 = vmatpush1.bf16.msra.mxu0 %v856_v18 }
  0x40   :  { %354 = vmatpush1.bf16.msra.mxu1 %v819_v37  ;;  %604 = vmatprep.subr.bf16.mxu0 %v861_v19 }
  0x43   :  { %605 = vmatpush1.bf16.msra.mxu0 %v859_v20 }
  0x44   :  { %606 = vmatprep.subr.bf16.mxu0 %v864_v21 }
  0x47   :  { %607 = vmatpush1.bf16.msra.mxu0 %v862_v22 }
  0x48   :  { %608 = vmatprep.subr.bf16.mxu0 %v867_v23 }
  0x4b   :  { %609 = vmatpush1.bf16.msra.mxu0 %v865_v24 }
  0xdd   :  { %v104_v3 = vpop.f32.mrb[0].mxu0 }
  0xde   :  { %v105_v4 = vadd.f32 %v104_v3, %v39_v1  ;;  %v106_v5 = vpop.f32.mrb[1].mxu0 }
  0xdf   :  { %v107_v6 = vadd.f32 %v106_v5, %v43_v2  ;;  %v108_v7 = vpop.f32.mrb[2].mxu0 }
  0xe0   :  { %v661_v8 = vclamps-f32 %v105_v4, 10.0  ;;  %v109_v9 = vpop.f32.mrb[3].mxu0 }
  0xe1   :  { %v662_v10 = vclamps-f32 %v107_v6, 10.0 }
  0xe2   :  { %868 = vtanh.f32 %v661_v8 }
  0xe3   :  { %870 = vtanh.f32 %v662_v10 }
  0xec   :  { %v869_v11 = vpop.eup %868 }
  0xed   :  { %v871_v12 = vpop.eup %870  ;;  %v150_v14 = vpack.c.bf16 %v869_v11, %v869_v11 }
  0xee   :  { %v151_v13 = vpack.c.bf16 %v871_v12, %v871_v12 }
  0xf0   :  { %355 = vmatprep.mubr.bf16.mxu1 %v151_v13 }
  0xf1   :  { %356 = vmatmul.mubr.bf16.vlgmr.msra.gmra.mrb[0].mxu1 %v150_v14 }
 0x1c4   :  { %v357_v28 = vpop.f32.mrb[0].mxu1 }
 0x1c5   :  { %v358_v29 = vadd.f32 %v357_v28, %v156_v26  ;;  %v359_v30 = vpop.f32.mrb[1].mxu1 }
 0x1c6   :  { %v360_v31 = vadd.f32 %v359_v30, %v160_v27  ;;  %v361_v32 = vpop.f32.mrb[2].mxu1 }
 0x1c7   :  { %v695_v33 = vclamps-f32 %v358_v29, 10.0  ;;  %v362_v34 = vpop.f32.mrb[3].mxu1 }
 0x1c8   :  { %v696_v35 = vclamps-f32 %v360_v31, 10.0 }
 0x1c9   :  { %872 = vtanh.f32 %v695_v33 }
 0x1ca   :  { %874 = vtanh.f32 %v696_v35 }
 0x1d3   :  { %v873_v36 = vpop.eup %872 }
 0x1d4   :  { %v875_v37 = vpop.eup %874  ;;  %v405_v39 = vpack.c.bf16 %v873_v36, %v873_v36 }
 0x1d5   :  { %v406_v38 = vpack.c.bf16 %v875_v37, %v875_v37 }
 0x1d7   :  { %610 = vmatprep.mubr.bf16.mxu0 %v406_v38 }
 0x1d8   :  { %611 = vmatmul.mubr.bf16.vlgmr.msra.gmra.mrb[4].mxu0 %v405_v39 }
 0x2ab   :  { %v612_v44 = vpop.f32.mrb[4].mxu0 }
 0x2ac   :  { %v613_v45 = vadd.f32 %v612_v44, %v411_v42  ;;  %v614_v46 = vpop.f32.mrb[5].mxu0 }
 0x2ad   :  { %v615_v47 = vadd.f32 %v614_v46, %v415_v43  ;;  %v616_v48 = vpop.f32.mrb[6].mxu0 }
 0x2ae   :  { %v762_v49 = vclamps-f32 %v613_v45, 10.0  ;;  %v617_v50 = vpop.f32.mrb[7].mxu0 }
 0x2af   :  { %v763_v51 = vclamps-f32 %v615_v47, 10.0 }
 0x2b0   :  { %876 = vtanh.f32 %v762_v49 }
 0x2b1   :  { %878 = vtanh.f32 %v763_v51 }
 0x2ba   :  { %v877_v55 = vpop.eup %876 }
 0x2bb   :  { %v879_v56 = vpop.eup %878  ;;  %v637_v57 = vmul.f32 %v877_v55, %v630_v53 }
 0x2bc   :  { %v638_v58 = vmul.f32 %v879_v56, %v634_v54 }
 0x2be   :  { %v639_v59 = vadd.f32 %v638_v58, %v637_v57 }
 0x2c0   :  { %640 = vadd.xlane.f32.xlu0 %v639_v59 }
 0x34d   :  { %v641_v61 = vpop.xlane.xlu0 %640 }
 0x34e   :  { %v649_v63 = vadd.f32 %v764_v60, %v641_v61 }
 0x350   :  { %651 = vst.msk [vmem:[%s1165_s7] sm:$0xff] %vm650_vm1, %v649_v63 }

</bundles_post_ra>
